<compile_context>
chip_gen: v7x
topology: tpu7x:2x2x1
jax: 0.10.0
libtpu: 0.0.40
codegen_flags: <defaults>
</compile_context>

<pallas_src>
import functools

import jax
import jax.numpy as jnp
from jax import lax
from jax.experimental import pallas as pl
from jax.experimental.pallas import tpu as pltpu


def _hash_u32(x):
    """lowbias32-style 32-bit integer finalizer (stateless, per element)."""
    x = x ^ (x >> jnp.uint32(16))
    x = x * jnp.uint32(0x7FEB352D)
    x = x ^ (x >> jnp.uint32(15))
    x = x * jnp.uint32(0x846CA68B)
    x = x ^ (x >> jnp.uint32(16))
    return x


def _word_dropout_kernel(seed_ref, word_ids_ref, nwords_ref, out_ref, *,
                         p, unknown, pad, tb):
    w = word_ids_ref[...]                                    # [TB, S] int32
    TB, S = w.shape

    # Global element coordinates: unique across the whole array, so every grid
    # step (and both TensorCores under "parallel") draws an independent stream.
    rows = lax.broadcasted_iota(jnp.int32, (TB, S), 0) + pl.program_id(0) * tb
    cols = lax.broadcasted_iota(jnp.int32, (TB, S), 1)

    # pad mask: position index < nwords[b]   (nwords_ref is [TB, 1], lane bcast)
    pad_mask = cols < nwords_ref[...]

    # Bernoulli(p) from a counter-based hash of (seed, flat element index).
    if p >= 1.0:                                   # exact p=1 not representable
        dropped = jnp.full((TB, S), jnp.int32(unknown))
    elif p <= 0.0:
        dropped = w
    else:
        seed = seed_ref[0].astype(jnp.uint32)
        ctr = (rows * S + cols).astype(jnp.uint32)
        bits = _hash_u32(ctr + seed * jnp.uint32(0x9E3779B9))
        threshold = jnp.uint32(min(int(p * 4294967296.0), 4294967295))
        drop_mask = bits < threshold               # P(drop) = p
        dropped = jnp.where(drop_mask, jnp.int32(unknown), w)

    out_ref[...] = jnp.where(pad_mask, dropped, jnp.int32(pad))


def _choose_block_rows(B, S, target_bytes=2 * 1024 * 1024):
    """Rows per block so a block is ~target_bytes of int32; multiple of 8."""
    rows = max(1, target_bytes // (4 * max(S, 1)))
    if rows >= B:
        return B                                   # full array dim is allowed
    return max(8, (rows // 8) * 8)                 # second-to-last dim % 8 == 0


def word_dropout(word_ids, nwords, seed, *, p, unknown=1, pad=0, training=True):
    """word_ids: [B, S] int32, nwords: [B] int32, seed: int / int32 scalar."""
    if not training:
        return word_ids
    if word_ids.dtype != jnp.int32:                # avoid extra HBM pass if i32
        word_ids = word_ids.astype(jnp.int32)

    B, S = word_ids.shape
    nwords2d = nwords.reshape(B, 1).astype(jnp.int32)
    seed_arr = jnp.asarray([seed], dtype=jnp.int32)

    tb = _choose_block_rows(B, S)
    grid = (pl.cdiv(B, tb),)

    kernel = functools.partial(_word_dropout_kernel,
                               p=p, unknown=unknown, pad=pad, tb=tb)

    grid_spec = pltpu.PrefetchScalarGridSpec(
        num_scalar_prefetch=1,                     # seed lands in SMEM
        grid=grid,
        in_specs=[
            pl.BlockSpec((tb, S), lambda i, seed: (i, 0)),   # word_ids
            pl.BlockSpec((tb, 1), lambda i, seed: (i, 0)),   # nwords
        ],
        out_specs=pl.BlockSpec((tb, S), lambda i, seed: (i, 0)),
    )

    cost = pl.CostEstimate(flops=12 * B * S, transcendentals=0,
                           bytes_accessed=2 * B * S * 4 + B * 4)

    return pl.pallas_call(
        kernel,
        out_shape=jax.ShapeDtypeStruct((B, S), jnp.int32),
        grid_spec=grid_spec,
        compiler_params=pltpu.CompilerParams(
            dimension_semantics=("parallel",),     # independent blocks -> 2 TCs
        ),
        cost_estimate=cost,
    )(seed_arr, word_ids, nwords2d)


if __name__ == "__main__":
    key = jax.random.PRNGKey(0)
    k1, k2 = jax.random.split(key)

    B, S = 4, 16
    word_ids = jax.random.randint(k1, (B, S), minval=2, maxval=100,
                                  dtype=jnp.int32)
    nwords = jax.random.randint(k2, (B,), minval=1, maxval=S + 1,
                                dtype=jnp.int32)

    out = word_dropout(word_ids, nwords, seed=1234,
                       p=0.3, unknown=1, pad=0, training=True)
    out = jax.block_until_ready(out)

    # Sanity checks on the semantics (not a bitwise torch reference — RNG
    # stream differs): padded positions must be `pad`, un-padded positions
    # must be either the original id or `unknown`.
    pos = jnp.arange(S)[None, :]
    pad_mask = pos < nwords[:, None]
    assert out.shape == (B, S) and out.dtype == jnp.int32
    assert bool(jnp.all(jnp.where(pad_mask, True, out == 0)))
    assert bool(jnp.all(jnp.where(pad_mask,
                                  (out == word_ids) | (out == 1), True)))

    # Eval mode is identity.
    out_eval = word_dropout(word_ids, nwords, seed=1234, p=0.3, training=False)
    assert bool(jnp.all(out_eval == word_ids))

    print("KERNEL_OK")
</pallas_src>

<mosaic_0001>
module attributes {stable_mosaic.version = 11 : i64} {
  func.func @_word_dropout_kernel(%arg0: i32, %arg1: memref<1xi32, #tpu.memory_space<smem>>, %arg2: memref<4x16xi32, #tpu.memory_space<vmem>>, %arg3: memref<4x1xi32, #tpu.memory_space<vmem>>, %arg4: memref<4x16xi32, #tpu.memory_space<vmem>>) attributes {dimension_semantics = [#tpu.dimension_semantics<parallel>], iteration_bounds = array<i64: 1>, scalar_prefetch = 1 : i64, scratch_operands = 0 : i64, tpu.core_type = #tpu.core_type<tc>, window_params = [{transform_indices = @transform_0, window_bounds = array<i64: 4, 16>}, {transform_indices = @transform_1, window_bounds = array<i64: 4, 1>}, {transform_indices = @transform_2, window_bounds = array<i64: 4, 16>}]} {
    %c0 = arith.constant 0 : index
    %c0_0 = arith.constant 0 : index
    %0 = vector.load %arg2[%c0, %c0_0] : memref<4x16xi32, #tpu.memory_space<vmem>>, vector<4x16xi32>
    %1 = tpu.iota {dimensions = array<i32: 0>} : vector<4x16xi32>
    %c4_i32 = arith.constant 4 : i32
    %2 = arith.muli %arg0, %c4_i32 : i32
    %3 = vector.broadcast %2 : i32 to vector<4x16xi32>
    %4 = arith.addi %1, %3 : vector<4x16xi32>
    %5 = tpu.iota {dimensions = array<i32: 1>} : vector<4x16xi32>
    %c0_1 = arith.constant 0 : index
    %c0_2 = arith.constant 0 : index
    %6 = vector.load %arg3[%c0_1, %c0_2] : memref<4x1xi32, #tpu.memory_space<vmem>>, vector<4x1xi32>
    %7 = vector.broadcast %6 : vector<4x1xi32> to vector<4x16xi32>
    %8 = arith.cmpi slt, %5, %7 : vector<4x16xi32>
    %c0_3 = arith.constant 0 : index
    %9 = memref.load %arg1[%c0_3] : memref<1xi32, #tpu.memory_space<smem>>
    %c16_i32 = arith.constant 16 : i32
    %10 = vector.broadcast %c16_i32 : i32 to vector<4x16xi32>
    %11 = arith.muli %4, %10 : vector<4x16xi32>
    %12 = arith.addi %11, %5 : vector<4x16xi32>
    %c-1640531527_i32 = arith.constant -1640531527 : i32
    %13 = arith.muli %9, %c-1640531527_i32 : i32
    %14 = vector.broadcast %13 : i32 to vector<4x16xi32>
    %15 = arith.addi %12, %14 : vector<4x16xi32>
    %c16_i32_4 = arith.constant 16 : i32
    %16 = vector.broadcast %c16_i32_4 : i32 to vector<4x16xi32>
    %17 = arith.shrui %15, %16 : vector<4x16xi32>
    %18 = arith.xori %15, %17 : vector<4x16xi32>
    %c2146121005_i32 = arith.constant 2146121005 : i32
    %19 = vector.broadcast %c2146121005_i32 : i32 to vector<4x16xi32>
    %20 = arith.muli %18, %19 : vector<4x16xi32>
    %c15_i32 = arith.constant 15 : i32
    %21 = vector.broadcast %c15_i32 : i32 to vector<4x16xi32>
    %22 = arith.shrui %20, %21 : vector<4x16xi32>
    %23 = arith.xori %20, %22 : vector<4x16xi32>
    %c-2073254261_i32 = arith.constant -2073254261 : i32
    %24 = vector.broadcast %c-2073254261_i32 : i32 to vector<4x16xi32>
    %25 = arith.muli %23, %24 : vector<4x16xi32>
    %c16_i32_5 = arith.constant 16 : i32
    %26 = vector.broadcast %c16_i32_5 : i32 to vector<4x16xi32>
    %27 = arith.shrui %25, %26 : vector<4x16xi32>
    %28 = arith.xori %25, %27 : vector<4x16xi32>
    %c1288490188_i32 = arith.constant 1288490188 : i32
    %29 = vector.broadcast %c1288490188_i32 : i32 to vector<4x16xi32>
    %30 = arith.cmpi ult, %28, %29 : vector<4x16xi32>
    %c1_i32 = arith.constant 1 : i32
    %31 = vector.broadcast %c1_i32 : i32 to vector<4x16xi32>
    %32 = arith.select %30, %31, %0 : vector<4x16xi1>, vector<4x16xi32>
    %c0_i32 = arith.constant 0 : i32
    %33 = vector.broadcast %c0_i32 : i32 to vector<4x16xi32>
    %34 = arith.select %8, %32, %33 : vector<4x16xi1>, vector<4x16xi32>
    %c0_6 = arith.constant 0 : index
    %c0_7 = arith.constant 0 : index
    %35 = vector.load %arg4[%c0_6, %c0_7] : memref<4x16xi32, #tpu.memory_space<vmem>>, vector<4x16xi32>
    tpu.vector_store %arg4[%c0_6, %c0_7], %34 {strides = array<i32>} : memref<4x16xi32, #tpu.memory_space<vmem>>, vector<4x16xi32>,
    return
  }
  func.func @transform_0(%arg0: i32, %arg1: memref<1xi32, #tpu.memory_space<smem>>) -> (i32, i32) {
    %c0_i32 = arith.constant 0 : i32
    %c0_i32_0 = arith.constant 0 : i32
    return %arg0, %c0_i32 : i32, i32
  }
  func.func @transform_1(%arg0: i32, %arg1: memref<1xi32, #tpu.memory_space<smem>>) -> (i32, i32) {
    %c0_i32 = arith.constant 0 : i32
    %c0_i32_0 = arith.constant 0 : i32
    return %arg0, %c0_i32 : i32, i32
  }
  func.func @transform_2(%arg0: i32, %arg1: memref<1xi32, #tpu.memory_space<smem>>) -> (i32, i32) {
    %c0_i32 = arith.constant 0 : i32
    %c0_i32_0 = arith.constant 0 : i32
    return %arg0, %c0_i32 : i32, i32
  }
}

</mosaic_0001>

<bundles_post_ra>
// kernel: tpu_custom_call.1
= control target key start
LH: loop header
LB: loop body
LE: loop exit
PB: predicated region body
PF: predicated region fallthrough
CT: control target
= control target key end

     0   :  { %v87_v1 = vmov 0   ;;  %s130_s0 = inlined_call_operand.<no memory space> [shape: s32[1], index: 0, kind: input, shape index: {}]   ;;  %s131_s1 = inlined_call_operand.vmem [shape: s32[4,16], index: 1, kind: input, shape index: {}]   ;;  %s132_s2 = inlined_call_operand.vmem [shape: s32[4,1], index: 2, kind: input, shape index: {}]   ;;  %s133_s3 = inlined_call_operand.hbm [shape: s32[4,16], index: 3, kind: output, shape index: {}]  }
   0x1   :  { %v22_v0 = vld [vmem:[%s132_s2] sm:$0xf]  ;;  %62 = vset.pattern.permute.xlu0 %v87_v1 }
   0x2   :  { %9 = vsyncpa [#allocation5], 0  ;;  %24 = vperm.xlu0 %62, %v22_v0   ;;  %v15_v2 = vlaneseq  ;;  %s30_s16 = smul.u32 2654435769, %s130_s0  ;;  %v14_v17 = vld [vmem:[%s131_s1] sm:$0xf] }
   0x3   :  { %s88_s18 = smov [#allocation4]   ;;  %vm44_vm1 = vcmask 125952  }
   0x4   :  { %v16_v3 = vshrl.u32 %v15_v2, 7  ;;  %v21_v4 = vand.u32 127, %v15_v2  ;;  %v31_v7 = vstv %s30_s16  ;;  %s52_s19 = sshll.u32 %s88_s18, 4  ;;  %s53_s19 = int_to_ptr.vmem [resolvable:$true] %s52_s19 }
   0x5   :  { %s63_s0 = scalar_lea.vmem %s53_s19, 64  ;;  %p68_p1 = scmp.lt.s32.totalorder %s53_s19, %s53_s19 }
   0x6   :  { %v28_v5 = vmul.u32 16, %v16_v3  ;;  %p64_p0 = scmp.ne.s32.totalorder %s53_s19, %s63_s0  ;;  %p69_p2 = scmp.lt.s32.totalorder %s63_s0, %s63_s0 }
   0x8   :  { %v29_v6 = vadd.s32 %v28_v5, %v21_v4  ;;  %p70_p3 = por %p69_p2, %p68_p1 }
   0xa   :  { %v32_v8 = vadd.s32 %v31_v7, %v29_v6  ;;  %p71_p4 = pnand %p70_p3, %p64_p0 }
   0xc   :  { %v33_v9 = vshrl.u32 %v32_v8, 16 }
   0xe   :  { %v34_v10 = vxor.u32 %v33_v9, %v32_v8 }
  0x10   :  { %v35_v11 = vmul.u32 2146121005, %v34_v10 }
  0x12   :  { %v36_v12 = vshrl.u32 %v35_v11, 15 }
  0x14   :  { %v37_v13 = vxor.u32 %v36_v12, %v35_v11 }
  0x16   :  { %v38_v14 = vmul.u32 2221713035, %v37_v13 }
  0x18   :  { %v39_v15 = vshrl.u32 %v38_v14, 16 }
  0x1a   :  { %v40_v16 = vxor.u32 %v39_v15, %v38_v14 }
  0x1c   :  { %vm41_vm0 = vcmp.lt.u32.totalorder %v40_v16, 1288490188 }
  0x1d   :  { %v42_v18 = vsel %vm41_vm0, 1, %v14_v17 }
  0x81   :  { %v25_v19 = vpop.permute.xlu0 %24 }
  0x82   :  { %vm26_vm2 = vcmp.lt.s32.totalorder %v21_v4, %v25_v19 }
  0x83   :  { %v43_v20 = vsel %vm26_vm2, %v42_v18, 0 }
  0x84   :  { %45 = vst.msk [vmem:[#allocation4] sm:$0xf] %vm44_vm1, %v43_v20 }
  0x85   :  { %74 = shalt.err (!%p71_p4)
}
  0x86   :  { %s75_s1 = scalar_lea.hbm %s133_s3, 64 }
  0x87   :  { %p76_p5 = scmp.ne.s32.totalorder %s133_s3, %s75_s1  ;;  %p79_p6 = scmp.lt.u32.totalorder %s75_s1, %s133_s3 }
  0x89   :  { %p81_p7 = pnand %p79_p6, %p76_p5 }
  0x8b   :  { %84 = shalt.err (!%p81_p7)
}
  0x8c   :  { %55 = dma.vmem_to_hbm [thread:$0]  %s53_s19, 64, %s133_s3, [#allocation5]  }
  0x8d   :  { %85 = dma.done.wait [#allocation5], 64  }
  0x8e   :  { %86 = vsyncadd [#allocation5], 4294967232 }
  0x8f   :  { %59 = vsyncpa [#allocation5], 1 }

</bundles_post_ra>
